<compile_context>
chip_gen: v7x
topology: tpu7x:2x2x1
jax: 0.10.0
libtpu: 0.0.40
codegen_flags: <defaults>
</compile_context>

<pallas_src>
import functools

import jax
import jax.numpy as jnp
from jax.experimental import pallas as pl
from jax.experimental.pallas import tpu as pltpu


NEG_SLOPE = 0.01   # F.leaky_relu default negative_slope


def _round_up(n, m):
    return ((n + m - 1) // m) * m


def _leaky_relu(x):
    # single vmax instead of vcmp+vsel (exact for slope < 1)
    return jnp.maximum(x, NEG_SLOPE * x)


def critic_kernel(x_ref, w1_ref, b1_ref, w2_ref, b2_ref, w3_ref, b3_ref, o_ref):
    wdt = w1_ref.dtype   # f32 or bf16; dots always accumulate in f32

    # FC1: single fused K = state_size + action_size matmul (concat done once
    # in the wrapper, so no split/accumulate pass and half the MXU pushes).
    h1 = jnp.dot(x_ref[...].astype(wdt), w1_ref[...],
                 preferred_element_type=jnp.float32) + b1_ref[...]
    h1 = _leaky_relu(h1)

    # FC2
    h2 = jnp.dot(h1.astype(wdt), w2_ref[...],
                 preferred_element_type=jnp.float32) + b2_ref[...]
    h2 = _leaky_relu(h2)

    # Output layer (nh2 -> 1): an N=1 MXU matmul wastes the matmul unit, so do
    # the multiply + lane reduction on the VPU/XLU instead.
    q = jnp.sum(h2 * w3_ref[...].astype(jnp.float32), axis=-1, keepdims=True) \
        + b3_ref[...]                                            # (tb, 1) f32

    # Direct (tb, 1) store: a masked vst per 8 rows, but the HBM writeback is
    # 128x smaller than the previous lane-padded store.
    o_ref[...] = q


def critic_forward(state, action, params, *, max_tile_b=2048,
                   small_batch_threshold=256):
    """CriticNetwork3Layer.forward:
       Output(lrelu(FC2(lrelu(FC1(cat(state, action), dim=1)))))"""
    B = state.shape[0]

    # Small-batch fast path: a single tiny grid step is dominated by
    # pallas_call launch + DMA latency; XLA's fused small GEMMs win there.
    if B <= small_batch_threshold:
        return critic_reference(state, action, params)

    w1, b1, w2, b2, w3_row, b3 = params
    d_in = w1.shape[0]
    nh1 = w1.shape[1]
    nh2 = w2.shape[1]

    # One concat in the wrapper (tiny: d_in columns) so FC1 is a single dot.
    x = jnp.concatenate([state, action], axis=1)

    # Batch tiling:
    #  - tb multiple of 8 sublanes,
    #  - at least 2 grid steps when the batch allows it (v7x has 2 TCs and the
    #    grid axis is marked "parallel"),
    #  - tb derived from cdiv(B, n_tiles) so padding waste stays small.
    n_tiles = pl.cdiv(B, max_tile_b)
    if n_tiles < 2 and B >= 16:
        n_tiles = 2
    tb = _round_up(pl.cdiv(B, n_tiles), 8)
    b_pad = _round_up(B, tb)
    if b_pad != B:
        x = jnp.pad(x, ((0, b_pad - B), (0, 0)))
    grid = (b_pad // tb,)

    # x / out tiles stream over the batch grid; weights & biases use a constant
    # index_map so they stay VMEM-resident across grid iterations.
    resident = lambda shape: pl.BlockSpec(shape, lambda i: (0, 0))

    out = pl.pallas_call(
        critic_kernel,
        out_shape=jax.ShapeDtypeStruct((b_pad, 1), jnp.float32),
        grid=grid,
        in_specs=[
            pl.BlockSpec((tb, d_in), lambda i: (i, 0)),
            resident((d_in, nh1)),
            resident((1, nh1)),
            resident((nh1, nh2)),
            resident((1, nh2)),
            resident((1, nh2)),
            resident((1, 1)),
        ],
        out_specs=pl.BlockSpec((tb, 1), lambda i: (i, 0)),
        compiler_params=pltpu.CompilerParams(
            dimension_semantics=("parallel",)),  # shards tiles across v7x's 2 TCs
    )(x, w1, b1, w2, b2, w3_row, b3)

    return out[:B]


def init_params(key, state_size, action_size, nh1=64, nh2=64,
                dtype=jnp.float32):
    """Deterministic synthetic params.  Weights stored as [in, out] (transposed
    w.r.t. PyTorch's [out, in]); the output weight is a (1, nh2) row for the
    VPU reduction.  `dtype` controls the matmul-weight storage dtype (bf16 on
    v6e/v7x halves weight DMA bytes and LHS vreg pushes); biases and the
    output row stay f32."""
    ks = jax.random.split(key, 6)
    d_in = state_size + action_size

    def lin(kw, kb, fan_in, fan_out):
        # mimic nn.Linear default init: U(-1/sqrt(fan_in), 1/sqrt(fan_in))
        bound = 1.0 / jnp.sqrt(jnp.float32(fan_in))
        w = jax.random.uniform(kw, (fan_in, fan_out), jnp.float32, -bound, bound)
        b = jax.random.uniform(kb, (1, fan_out), jnp.float32, -bound, bound)
        return w, b

    w1, b1 = lin(ks[0], ks[1], d_in, nh1)
    w2, b2 = lin(ks[2], ks[3], nh1, nh2)
    w3, b3 = lin(ks[4], ks[5], nh2, 1)

    w3_row = w3.T            # (1, nh2)
    b3 = b3.reshape(1, 1)
    return (w1.astype(dtype), b1, w2.astype(dtype), b2, w3_row, b3)


def critic_reference(state, action, params):
    """Pure-XLA forward; mirrors the kernel math exactly (also used as the
    small-batch fast path)."""
    w1, b1, w2, b2, w3_row, b3 = params
    wdt = w1.dtype
    x = jnp.concatenate([state, action], axis=1)
    h1 = _leaky_relu(jnp.dot(x.astype(wdt), w1,
                             preferred_element_type=jnp.float32) + b1)
    h2 = _leaky_relu(jnp.dot(h1.astype(wdt), w2,
                             preferred_element_type=jnp.float32) + b2)
    return jnp.sum(h2 * w3_row.astype(jnp.float32), axis=-1, keepdims=True) + b3


if __name__ == "__main__":
    key = jax.random.PRNGKey(0)
    k_s, k_a, k_p = jax.random.split(key, 3)

    state_size, action_size = 24, 8
    nh1, nh2 = 64, 64

    params = init_params(k_p, state_size, action_size, nh1, nh2,
                         dtype=jnp.float32)

    # Case 1: small batch — force the Pallas kernel (threshold=0) so it is
    # exercised even though the default dispatch would take the XLA fast path.
    B1 = 8
    s1 = jax.random.normal(k_s, (B1, state_size), jnp.float32)
    a1 = jax.random.normal(k_a, (B1, action_size), jnp.float32)
    fwd_force = jax.jit(functools.partial(critic_forward,
                                          small_batch_threshold=0))
    out1 = jax.block_until_ready(fwd_force(s1, a1, params))
    ref1 = critic_reference(s1, a1, params)
    assert out1.shape == (B1, 1), out1.shape
    assert jnp.allclose(out1, ref1, atol=1e-4, rtol=1e-4), "mismatch (B=8)"

    # Case 2: non-multiple batch -> exercises padding + a 2-step "parallel"
    # grid; B > small_batch_threshold so the default dispatch uses Pallas.
    B2 = 300
    s2 = jax.random.normal(jax.random.fold_in(k_s, 1), (B2, state_size),
                           jnp.float32)
    a2 = jax.random.normal(jax.random.fold_in(k_a, 1), (B2, action_size),
                           jnp.float32)
    fwd = jax.jit(critic_forward)
    out2 = jax.block_until_ready(fwd(s2, a2, params))
    ref2 = critic_reference(s2, a2, params)
    assert out2.shape == (B2, 1), out2.shape
    assert jnp.allclose(out2, ref2, atol=1e-4, rtol=1e-4), "mismatch (B=300)"

    # Case 3: bf16 weights (v6e/v7x path), f32 accumulation, looser tolerance.
    params_bf16 = init_params(k_p, state_size, action_size, nh1, nh2,
                              dtype=jnp.bfloat16)
    out3 = jax.block_until_ready(fwd_force(s2, a2, params_bf16))
    ref3 = critic_reference(s2, a2, params_bf16)
    assert jnp.allclose(out3, ref3, atol=5e-2, rtol=5e-2), "mismatch (bf16)"

    # Case 4: default dispatch at tiny batch uses the XLA fast path.
    out4 = jax.block_until_ready(jax.jit(critic_forward)(s1, a1, params))
    assert jnp.allclose(out4, ref1, atol=1e-4, rtol=1e-4), "mismatch fast path"

    print("KERNEL_OK")
</pallas_src>

<mosaic_0001>
module attributes {stable_mosaic.version = 11 : i64} {
  func.func @critic_kernel(%arg0: i32, %arg1: memref<8x32xf32, #tpu.memory_space<vmem>>, %arg2: memref<32x64xf32, #tpu.memory_space<vmem>>, %arg3: memref<1x64xf32, #tpu.memory_space<vmem>>, %arg4: memref<64x64xf32, #tpu.memory_space<vmem>>, %arg5: memref<1x64xf32, #tpu.memory_space<vmem>>, %arg6: memref<1x64xf32, #tpu.memory_space<vmem>>, %arg7: memref<1x1xf32, #tpu.memory_space<vmem>>, %arg8: memref<8x1xf32, #tpu.memory_space<vmem>>) attributes {dimension_semantics = [#tpu.dimension_semantics<parallel>], iteration_bounds = array<i64: 1>, scalar_prefetch = 0 : i64, scratch_operands = 0 : i64, tpu.core_type = #tpu.core_type<tc>, window_params = [{transform_indices = @transform_0, window_bounds = array<i64: 8, 32>}, {pipeline_mode = #tpu.pipeline_mode<synchronous>, transform_indices = @transform_1, window_bounds = array<i64: 32, 64>}, {pipeline_mode = #tpu.pipeline_mode<synchronous>, transform_indices = @transform_2, window_bounds = array<i64: 1, 64>}, {pipeline_mode = #tpu.pipeline_mode<synchronous>, transform_indices = @transform_3, window_bounds = array<i64: 64, 64>}, {pipeline_mode = #tpu.pipeline_mode<synchronous>, transform_indices = @transform_4, window_bounds = array<i64: 1, 64>}, {pipeline_mode = #tpu.pipeline_mode<synchronous>, transform_indices = @transform_5, window_bounds = array<i64: 1, 64>}, {pipeline_mode = #tpu.pipeline_mode<synchronous>, transform_indices = @transform_6, window_bounds = array<i64: 1, 1>}, {transform_indices = @transform_7, window_bounds = array<i64: 8, 1>}]} {
    %c0 = arith.constant 0 : index
    %c0_0 = arith.constant 0 : index
    %0 = vector.load %arg1[%c0, %c0_0] : memref<8x32xf32, #tpu.memory_space<vmem>>, vector<8x32xf32>
    %c0_1 = arith.constant 0 : index
    %c0_2 = arith.constant 0 : index
    %1 = vector.load %arg2[%c0_1, %c0_2] : memref<32x64xf32, #tpu.memory_space<vmem>>, vector<32x64xf32>
    %cst = arith.constant dense<0.000000e+00> : vector<8x64xf32>
    %2 = tpu.matmul %0, %1, %cst {dimension_numbers = #tpu.dot_dimension_numbers<[1], [0], [0], [1], [0, 0, 1, 1], [], []>} : vector<8x32xf32>, vector<32x64xf32>, vector<8x64xf32> -> vector<8x64xf32>
    %c0_3 = arith.constant 0 : index
    %c0_4 = arith.constant 0 : index
    %3 = vector.load %arg3[%c0_3, %c0_4] : memref<1x64xf32, #tpu.memory_space<vmem>>, vector<1x64xf32>
    %4 = vector.broadcast %3 : vector<1x64xf32> to vector<8x64xf32>
    %5 = arith.addf %2, %4 : vector<8x64xf32>
    %cst_5 = arith.constant 0.00999999977 : f32
    %6 = vector.broadcast %cst_5 : f32 to vector<8x64xf32>
    %7 = arith.mulf %6, %5 : vector<8x64xf32>
    %8 = arith.maximumf %5, %7 : vector<8x64xf32>
    %c0_6 = arith.constant 0 : index
    %c0_7 = arith.constant 0 : index
    %9 = vector.load %arg4[%c0_6, %c0_7] : memref<64x64xf32, #tpu.memory_space<vmem>>, vector<64x64xf32>
    %cst_8 = arith.constant dense<0.000000e+00> : vector<8x64xf32>
    %10 = tpu.matmul %8, %9, %cst_8 {dimension_numbers = #tpu.dot_dimension_numbers<[1], [0], [0], [1], [0, 0, 1, 1], [], []>} : vector<8x64xf32>, vector<64x64xf32>, vector<8x64xf32> -> vector<8x64xf32>
    %c0_9 = arith.constant 0 : index
    %c0_10 = arith.constant 0 : index
    %11 = vector.load %arg5[%c0_9, %c0_10] : memref<1x64xf32, #tpu.memory_space<vmem>>, vector<1x64xf32>
    %12 = vector.broadcast %11 : vector<1x64xf32> to vector<8x64xf32>
    %13 = arith.addf %10, %12 : vector<8x64xf32>
    %cst_11 = arith.constant 0.00999999977 : f32
    %14 = vector.broadcast %cst_11 : f32 to vector<8x64xf32>
    %15 = arith.mulf %14, %13 : vector<8x64xf32>
    %16 = arith.maximumf %13, %15 : vector<8x64xf32>
    %c0_12 = arith.constant 0 : index
    %c0_13 = arith.constant 0 : index
    %17 = vector.load %arg6[%c0_12, %c0_13] : memref<1x64xf32, #tpu.memory_space<vmem>>, vector<1x64xf32>
    %18 = vector.broadcast %17 : vector<1x64xf32> to vector<8x64xf32>
    %19 = arith.mulf %16, %18 : vector<8x64xf32>
    %cst_14 = arith.constant dense<0.000000e+00> : vector<8xf32>
    %20 = vector.multi_reduction <add>, %19, %cst_14 [1] : vector<8x64xf32> to vector<8xf32>
    %21 = vector.shape_cast %20 : vector<8xf32> to vector<8x1xf32>
    %c0_15 = arith.constant 0 : index
    %c0_16 = arith.constant 0 : index
    %22 = vector.load %arg7[%c0_15, %c0_16] : memref<1x1xf32, #tpu.memory_space<vmem>>, vector<1x1xf32>
    %23 = vector.broadcast %22 : vector<1x1xf32> to vector<8x1xf32>
    %24 = arith.addf %21, %23 : vector<8x1xf32>
    %c0_17 = arith.constant 0 : index
    %c0_18 = arith.constant 0 : index
    %25 = vector.load %arg8[%c0_17, %c0_18] : memref<8x1xf32, #tpu.memory_space<vmem>>, vector<8x1xf32>
    tpu.vector_store %arg8[%c0_17, %c0_18], %24 {strides = array<i32>} : memref<8x1xf32, #tpu.memory_space<vmem>>, vector<8x1xf32>,
    return
  }
  func.func @transform_0(%arg0: i32) -> (i32, i32) {
    %c0_i32 = arith.constant 0 : i32
    %c0_i32_0 = arith.constant 0 : i32
    return %arg0, %c0_i32 : i32, i32
  }
  func.func @transform_1(%arg0: i32) -> (i32, i32) {
    %c0_i32 = arith.constant 0 : i32
    %c0_i32_0 = arith.constant 0 : i32
    %c0_i32_1 = arith.constant 0 : i32
    return %c0_i32, %c0_i32_0 : i32, i32
  }
  func.func @transform_2(%arg0: i32) -> (i32, i32) {
    %c0_i32 = arith.constant 0 : i32
    %c0_i32_0 = arith.constant 0 : i32
    %c0_i32_1 = arith.constant 0 : i32
    return %c0_i32, %c0_i32_0 : i32, i32
  }
  func.func @transform_3(%arg0: i32) -> (i32, i32) {
    %c0_i32 = arith.constant 0 : i32
    %c0_i32_0 = arith.constant 0 : i32
    %c0_i32_1 = arith.constant 0 : i32
    return %c0_i32, %c0_i32_0 : i32, i32
  }
  func.func @transform_4(%arg0: i32) -> (i32, i32) {
    %c0_i32 = arith.constant 0 : i32
    %c0_i32_0 = arith.constant 0 : i32
    %c0_i32_1 = arith.constant 0 : i32
    return %c0_i32, %c0_i32_0 : i32, i32
  }
  func.func @transform_5(%arg0: i32) -> (i32, i32) {
    %c0_i32 = arith.constant 0 : i32
    %c0_i32_0 = arith.constant 0 : i32
    %c0_i32_1 = arith.constant 0 : i32
    return %c0_i32, %c0_i32_0 : i32, i32
  }
  func.func @transform_6(%arg0: i32) -> (i32, i32) {
    %c0_i32 = arith.constant 0 : i32
    %c0_i32_0 = arith.constant 0 : i32
    %c0_i32_1 = arith.constant 0 : i32
    return %c0_i32, %c0_i32_0 : i32, i32
  }
  func.func @transform_7(%arg0: i32) -> (i32, i32) {
    %c0_i32 = arith.constant 0 : i32
    %c0_i32_0 = arith.constant 0 : i32
    return %arg0, %c0_i32 : i32, i32
  }
}

</mosaic_0001>

<bundles_post_ra>
// kernel: critic_forward.1
= control target key start
LH: loop header
LB: loop body
LE: loop exit
PB: predicated region body
PF: predicated region fallthrough
CT: control target
= control target key end

     0   :  { %s433_s0 = inlined_call_operand.vmem [shape: f32[8,32], index: 0, kind: input, shape index: {}]   ;;  %s434_s1 = inlined_call_operand.vmem [shape: f32[32,64], index: 1, kind: input, shape index: {}]   ;;  %s435_s2 = inlined_call_operand.vmem [shape: f32[1,64], index: 2, kind: input, shape index: {}]   ;;  %s436_s3 = inlined_call_operand.hbm [shape: f32[64,64], index: 3, kind: input, shape index: {}]   ;;  %s437_s4 = inlined_call_operand.vmem [shape: f32[1,64], index: 4, kind: input, shape index: {}]   ;;  %s438_s5 = inlined_call_operand.vmem [shape: f32[1,64], index: 5, kind: input, shape index: {}]   ;;  %s439_s6 = inlined_call_operand.<no memory space> [shape: f32[1,1], index: 6, kind: input, shape index: {}]   ;;  %s440_s7 = inlined_call_operand.vmem [shape: f32[8,1], index: 7, kind: output, shape index: {}]  }
   0x1   :  { %v12_v0 = vstv %s439_s6 }
   0x2   :  { %13 = vst [vmem:[#allocation2] sm:$0x1] %v12_v0 }
   0x3   :  { %14 = vsyncpa [#allocation4], 0  ;;  %s345_s26 = smov [#allocation3]   ;;  %s321_s30 = scalar_lea.hbm %s436_s3, 1024 }
   0x4   :  { %s26_s27 = sshll.u32 %s345_s26, 4  ;;  %p322_p0 = scmp.ne.s32.totalorder %s436_s3, %s321_s30  ;;  %s27_s27 = int_to_ptr.vmem [resolvable:$true] %s26_s27 }
   0x5   :  { %p325_p1 = scmp.lt.u32.totalorder %s321_s30, %s436_s3 }
   0x7   :  { %p327_p2 = pnand %p325_p1, %p322_p0 }
   0x9   :  { %330 = shalt.err (!%p327_p2)
}
   0xa   :  { %s331_s6 = scalar_lea.vmem %s27_s27, 1024  ;;  %p336_p4 = scmp.lt.s32.totalorder %s27_s27, %s27_s27 }
   0xb   :  { %p332_p3 = scmp.ne.s32.totalorder %s27_s27, %s331_s6  ;;  %p337_p5 = scmp.lt.s32.totalorder %s331_s6, %s331_s6 }
   0xd   :  { %p338_p6 = por %p337_p5, %p336_p4 }
   0xf   :  { %p339_p7 = pnand %p338_p6, %p332_p3 }
  0x11   :  { %342 = shalt.err (!%p339_p7)
}
  0x12   :  { %s346_s12 = smov 128   ;;  %s347_s13 = smov 8  }
  0x13   :  { %32 = dma.hbm_to_vmem [thread:$0]  %s436_s3, 1024, %s27_s27, [#allocation4], %s346_s12, %s346_s12, %s347_s13  }
  0x14   :  { %343 = dma.done.wait [#allocation4], 1024  }
  0x15   :  { %344 = vsyncadd [#allocation4], 4294966272  ;;  %v348_v1 = vmov 0.0|0.0   ;;  %vm349_vm0 = vmmov 0   ;;  %v350_v2 = vmov 0.0   ;;  %v43_v3 = vld [vmem:[%s434_s1] sm:$0xff] }
  0x16   :  { %297 = vmatprep.subr.bf16.mxu0 %v348_v1  ;;  %275 = vmatprep.mubr.msk.f32.mxu0 %vm349_vm0, %v350_v2  ;;  %v44_v4 = vld [vmem:[%s434_s1 + $0x8] sm:$0xff]  ;;  %v45_v5 = vld [vmem:[%s434_s1 + $0x10] sm:$0xff]  ;;  %v46_v7 = vld [vmem:[%s434_s1 + $0x18] sm:$0xff]  ;;  %vm54_vm1 = vcmask 261120   ;;  %vm145_vm2 = vcmask 523264   ;;  %vm240_vm3 = vcmask 7168  }
  0x17   :  { %303 = vmatprep.subr.bf16.mxu1 %v348_v1  ;;  %294 = vmatprep.mubr.msk.f32.mxu1 %vm349_vm0, %v350_v2  ;;  %v298_v6 = vpack.c.bf16 %v44_v4, %v43_v3  ;;  %v130_v8 = vld [vmem:[#allocation3] sm:$0xff]  ;;  %v131_v9 = vld [vmem:[#allocation3 + $0x8] sm:$0xff]  ;;  %v132_v10 = vld [vmem:[#allocation3 + $0x10] sm:$0xff]  ;;  %v301_v12 = vpack.c.bf16 %v46_v7, %v45_v5 }
  0x18   :  { %v133_v11 = vld [vmem:[#allocation3 + $0x18] sm:$0xff]  ;;  %v304_v13 = vpack.c.bf16 %v131_v9, %v130_v8  ;;  %v134_v16 = vld [vmem:[#allocation3 + $0x20] sm:$0xff]  ;;  %v135_v17 = vld [vmem:[#allocation3 + $0x28] sm:$0xff] }
  0x19   :  { %299 = vmatpush3.bf16.msra.mxu0 %v298_v6  ;;  %v307_v14 = vpack.c.bf16 %v133_v11, %v132_v10  ;;  %v42_v15 = vld [vmem:[%s433_s0] sm:$0xff]  ;;  %v310_v18 = vpack.c.bf16 %v135_v17, %v134_v16  ;;  %v136_v19 = vld [vmem:[#allocation3 + $0x30] sm:$0xff] }
  0x1a   :  { %300 = vmatprep.subr.bf16.mxu0 %v348_v1  ;;  %305 = vmatpush3.bf16.msra.mxu1 %v304_v13  ;;  %v137_v20 = vld [vmem:[#allocation3 + $0x38] sm:$0xff] }
  0x1b   :  { %306 = vmatprep.subr.bf16.mxu1 %v348_v1  ;;  %v313_v21 = vpack.c.bf16 %v137_v20, %v136_v19  ;;  %v247_v22 = vld [vmem:[%s435_s2] ss:$0 sm:$0xff] }
  0x1c   :  { %v249_v28 = vld [vmem:[%s437_s4] ss:$0 sm:$0xff] }
  0x1d   :  { %302 = vmatpush3.bf16.msra.mxu0 %v301_v12  ;;  %v251_v33 = vld [vmem:[%s438_s5] ss:$0 sm:$0xff] }
  0x1e   :  { %308 = vmatpush3.bf16.msra.mxu1 %v307_v14  ;;  %v252_v37 = vld [vmem:[#allocation2] ss:$0 sm:$0xff] }
  0x1f   :  { %309 = vmatprep.subr.bf16.mxu1 %v348_v1 }
  0x20   :  { %276 = vmatmul.mubr.msk.f32.vlgmr.msra.gmra.mrb[0].mxu0 %vm54_vm1, %v42_v15 }
  0x22   :  { %311 = vmatpush3.bf16.msra.mxu1 %v310_v18 }
  0x23   :  { %312 = vmatprep.subr.bf16.mxu1 %v348_v1 }
  0x26   :  { %314 = vmatpush3.bf16.msra.mxu1 %v313_v21 }
  0xf3   :  { %v124_v23 = vpop.f32.mrb[0].mxu0 }
  0xf4   :  { %v125_v24 = vadd.f32 %v247_v22, %v124_v23  ;;  %v277_v25 = vpop.f32.mrb[1].mxu0 }
  0xf6   :  { %v128_v26 = vmul.f32 0.01, %v125_v24 }
  0xf8   :  { %v129_v27 = vmax.f32 %v125_v24, %v128_v26 }
  0xfa   :  { %295 = vmatmul.mubr.msk.f32.vlgmr.msra.gmra.mrb[0].mxu1 %vm145_vm2, %v129_v27 }
 0x1cd   :  { %v215_v29 = vpop.f32.mrb[0].mxu1 }
 0x1ce   :  { %v216_v30 = vadd.f32 %v249_v28, %v215_v29  ;;  %v296_v31 = vpop.f32.mrb[1].mxu1 }
 0x1d0   :  { %v219_v32 = vmul.f32 0.01, %v216_v30 }
 0x1d2   :  { %v220_v34 = vmax.f32 %v216_v30, %v219_v32 }
 0x1d4   :  { %v228_v35 = vmul.f32 %v251_v33, %v220_v34 }
 0x1d6   :  { %v229_v36 = vsel %vm145_vm2, %v228_v35, 0.0 }
 0x1d7   :  { %230 = vadd.xlane.f32.xlu0 %v229_v36 }
 0x264   :  { %v231_v38 = vpop.xlane.xlu0 %230 }
 0x265   :  { %v239_v39 = vadd.f32 %v252_v37, %v231_v38 }
 0x267   :  { %241 = vst.msk [vmem:[%s440_s7] sm:$0xff] %vm240_vm3, %v239_v39 }
 0x268   :  { %246 = vsyncpa [#allocation4], 1 }

</bundles_post_ra>
